<compile_context>
chip_gen: v5e
topology: v5e:2x2
jax: 0.10.0
libtpu: 0.0.40
codegen_flags: <defaults>
</compile_context>

<pallas_src>
import functools

import jax
import jax.numpy as jnp
from jax.experimental import pallas as pl
from jax.experimental.pallas import tpu as pltpu


def _causal_conv1d_kernel(x_prev_ref, x_cur_ref, w_ref, o_ref, *,
                          c_in, c_out, kernel_size, tile_l):
    """One (batch, time-tile) grid step.

    x_prev_ref: (1, C_in, tile_L)   previous time tile (== current tile when t == 0)
    x_cur_ref:  (1, C_in, tile_L)   current time tile
    w_ref:      (C_out, C_in * K)   weights, w_ref[o, c*K + k] == W[o, c, k]
    o_ref:      (1, C_out, tile_L)
    """
    t = pl.program_id(1)
    halo = kernel_size - 1

    x_cur = x_cur_ref[0].astype(jnp.float32)                          # (C_in, tile_L)
    if halo > 0:
        # Last K-1 time columns of the previous tile; zero on the first tile
        # (causal left padding lives entirely inside the kernel).
        left = x_prev_ref[0, :, tile_l - halo:].astype(jnp.float32)   # (C_in, K-1)
        left = jnp.where(t > 0, left, jnp.zeros_like(left))
        window = jnp.concatenate([left, x_cur], axis=-1)              # (C_in, tile_L+K-1)
    else:
        window = x_cur

    w = w_ref[...].astype(jnp.float32)                                # (C_out, C_in*K)

    # VPU shifted multiply-accumulate: time stays in lanes; each (c, k) tap is a
    # rank-1 update  acc[o, :] += W[o, c, k] * window[c, k : k + tile_L].
    acc = jnp.zeros((c_out, tile_l), dtype=jnp.float32)
    for c in range(c_in):
        for k in range(kernel_size):
            j = c * kernel_size + k
            w_col = w[:, j:j + 1]                                     # (C_out, 1)
            x_row = window[c:c + 1, k:k + tile_l]                     # (1, tile_L)
            acc = acc + w_col * x_row

    o_ref[0] = acc.astype(o_ref.dtype)


def _pick_time_tile(length: int, max_tile: int = 512) -> int:
    """Largest lane-dense time tile: full length if small, else a 128-multiple divisor."""
    if length <= max_tile:
        return length
    for cand in (512, 384, 256, 128):
        if length % cand == 0:
            return cand
    # TODO(synk): ragged last time tile not handled; fall back to one full-length tile.
    return length


def causal_conv1d(x_ncl, weight_ock):
    """x_ncl: (N, C_in, L); weight_ock: (C_out, C_in, K) (PyTorch Conv1d layout)."""
    n, c_in, length = x_ncl.shape
    c_out, c_in_w, k = weight_ock.shape
    assert c_in == c_in_w

    tile_l = _pick_time_tile(length)
    num_t = length // tile_l
    assert num_t * tile_l == length
    assert tile_l >= k - 1

    # Tiny weight repack only (64 floats): (C_out, C_in, K) -> (C_out, C_in*K).
    # No transpose / pad of the activation tensor.
    w2 = weight_ock.reshape(c_out, c_in * k)

    kernel = functools.partial(
        _causal_conv1d_kernel,
        c_in=c_in, c_out=c_out, kernel_size=k, tile_l=tile_l)

    x_cur_spec = pl.BlockSpec((1, c_in, tile_l), lambda nb, tb: (nb, 0, tb))
    x_prev_spec = pl.BlockSpec(
        (1, c_in, tile_l), lambda nb, tb: (nb, 0, jnp.maximum(tb - 1, 0)))
    w_spec = pl.BlockSpec((c_out, c_in * k), lambda nb, tb: (0, 0))
    out_spec = pl.BlockSpec((1, c_out, tile_l), lambda nb, tb: (nb, 0, tb))

    return pl.pallas_call(
        kernel,
        out_shape=jax.ShapeDtypeStruct((n, c_out, length), x_ncl.dtype),
        grid=(n, num_t),
        in_specs=[x_prev_spec, x_cur_spec, w_spec],
        out_specs=out_spec,
        compiler_params=pltpu.CompilerParams(
            dimension_semantics=("parallel", "parallel")),
    )(x_ncl, x_ncl, w2)


def _reference_causal_conv1d(x_ncl, weight_ock):
    """Pure-JAX reference matching PyTorch Conv1d(..., padding=K-1)[:, :, :-(K-1)]."""
    k = weight_ock.shape[-1]
    y = jax.lax.conv_general_dilated(
        x_ncl, weight_ock,
        window_strides=(1,),
        padding=[(k - 1, k - 1)],
        dimension_numbers=("NCH", "OIH", "NCH"),
    )
    if k > 1:
        y = y[:, :, :-(k - 1)]
    return y


if __name__ == "__main__":
    # Module config: CausalConv1d(input_channels=4, out_channels=8, kernel_size=2, bias=False)
    input_channels = 4
    out_channels = 8
    kernel_size = 2

    batch = 2
    length = 16

    key = jax.random.PRNGKey(0)
    kx, kw, kx2 = jax.random.split(key, 3)

    x = jax.random.normal(kx, (batch, input_channels, length), dtype=jnp.float32)
    # Deterministic synthetic weights, PyTorch Conv1d layout (C_out, C_in, K).
    bound = 1.0 / (input_channels * kernel_size) ** 0.5
    weight = jax.random.uniform(
        kw, (out_channels, input_channels, kernel_size),
        minval=-bound, maxval=bound, dtype=jnp.float32,
    )

    y = jax.block_until_ready(causal_conv1d(x, weight))
    y_ref = _reference_causal_conv1d(x, weight)
    assert y.shape == (batch, out_channels, length)
    assert jnp.allclose(y, y_ref, atol=1e-5, rtol=1e-5)

    # Also exercise the multi-time-tile halo path (L=1024 -> two 512-wide lane tiles).
    x2 = jax.random.normal(kx2, (batch, input_channels, 1024), dtype=jnp.float32)
    y2 = jax.block_until_ready(causal_conv1d(x2, weight))
    y2_ref = _reference_causal_conv1d(x2, weight)
    assert jnp.allclose(y2, y2_ref, atol=1e-5, rtol=1e-5)

    print("KERNEL_OK")
</pallas_src>

<mosaic_0001>
module attributes {stable_mosaic.version = 11 : i64} {
  func.func @_causal_conv1d_kernel(%arg0: i32, %arg1: i32, %arg2: memref<1x4x16xf32, #tpu.memory_space<vmem>>, %arg3: memref<1x4x16xf32, #tpu.memory_space<vmem>>, %arg4: memref<8x8xf32, #tpu.memory_space<vmem>>, %arg5: memref<1x8x16xf32, #tpu.memory_space<vmem>>) attributes {dimension_semantics = [#tpu.dimension_semantics<parallel>, #tpu.dimension_semantics<parallel>], iteration_bounds = array<i64: 2, 1>, scalar_prefetch = 0 : i64, scratch_operands = 0 : i64, tpu.core_type = #tpu.core_type<tc>, window_params = [{transform_indices = @transform_0, window_bounds = array<i64: 1, 4, 16>}, {transform_indices = @transform_1, window_bounds = array<i64: 1, 4, 16>}, {pipeline_mode = #tpu.pipeline_mode<synchronous>, transform_indices = @transform_2, window_bounds = array<i64: 8, 8>}, {transform_indices = @transform_3, window_bounds = array<i64: 1, 8, 16>}]} {
    %c0 = arith.constant 0 : index
    %c0_0 = arith.constant 0 : index
    %c0_1 = arith.constant 0 : index
    %0 = vector.load %arg3[%c0, %c0_0, %c0_1] : memref<1x4x16xf32, #tpu.memory_space<vmem>>, vector<1x4x16xf32>
    %1 = vector.shape_cast %0 : vector<1x4x16xf32> to vector<4x16xf32>
    %c0_2 = arith.constant 0 : index
    %c0_3 = arith.constant 0 : index
    %c15 = arith.constant 15 : index
    %2 = vector.load %arg2[%c0_2, %c0_3, %c15] : memref<1x4x16xf32, #tpu.memory_space<vmem>>, vector<1x4x1xf32>
    %3 = vector.shape_cast %2 : vector<1x4x1xf32> to vector<4x1xf32>
    %c0_i32 = arith.constant 0 : i32
    %4 = arith.cmpi sgt, %arg1, %c0_i32 : i32
    %cst = arith.constant 0.000000e+00 : f32
    %5 = vector.broadcast %cst : f32 to vector<4x1xf32>
    %6 = arith.select %4, %3, %5 : vector<4x1xf32>
    %7 = tpu.concatenate %6, %1 in 1 : vector<4x1xf32>, vector<4x16xf32> -> vector<4x17xf32>
    %c0_4 = arith.constant 0 : index
    %c0_5 = arith.constant 0 : index
    %8 = vector.load %arg4[%c0_4, %c0_5] : memref<8x8xf32, #tpu.memory_space<vmem>>, vector<8x8xf32>
    %cst_6 = arith.constant 0.000000e+00 : f32
    %9 = vector.broadcast %cst_6 : f32 to vector<8x16xf32>
    %10 = vector.extract_strided_slice %8 {offsets = [0, 0], sizes = [8, 1], strides = [1, 1]} : vector<8x8xf32> to vector<8x1xf32>
    %11 = vector.extract_strided_slice %7 {offsets = [0, 0], sizes = [1, 16], strides = [1, 1]} : vector<4x17xf32> to vector<1x16xf32>
    %12 = vector.broadcast %10 : vector<8x1xf32> to vector<8x16xf32>
    %13 = vector.broadcast %11 : vector<1x16xf32> to vector<8x16xf32>
    %14 = arith.mulf %12, %13 : vector<8x16xf32>
    %15 = arith.addf %9, %14 : vector<8x16xf32>
    %16 = vector.extract_strided_slice %8 {offsets = [0, 1], sizes = [8, 1], strides = [1, 1]} : vector<8x8xf32> to vector<8x1xf32>
    %17 = vector.extract_strided_slice %7 {offsets = [0, 1], sizes = [1, 16], strides = [1, 1]} : vector<4x17xf32> to vector<1x16xf32>
    %18 = vector.broadcast %16 : vector<8x1xf32> to vector<8x16xf32>
    %19 = vector.broadcast %17 : vector<1x16xf32> to vector<8x16xf32>
    %20 = arith.mulf %18, %19 : vector<8x16xf32>
    %21 = arith.addf %15, %20 : vector<8x16xf32>
    %22 = vector.extract_strided_slice %8 {offsets = [0, 2], sizes = [8, 1], strides = [1, 1]} : vector<8x8xf32> to vector<8x1xf32>
    %23 = vector.extract_strided_slice %7 {offsets = [1, 0], sizes = [1, 16], strides = [1, 1]} : vector<4x17xf32> to vector<1x16xf32>
    %24 = vector.broadcast %22 : vector<8x1xf32> to vector<8x16xf32>
    %25 = vector.broadcast %23 : vector<1x16xf32> to vector<8x16xf32>
    %26 = arith.mulf %24, %25 : vector<8x16xf32>
    %27 = arith.addf %21, %26 : vector<8x16xf32>
    %28 = vector.extract_strided_slice %8 {offsets = [0, 3], sizes = [8, 1], strides = [1, 1]} : vector<8x8xf32> to vector<8x1xf32>
    %29 = vector.extract_strided_slice %7 {offsets = [1, 1], sizes = [1, 16], strides = [1, 1]} : vector<4x17xf32> to vector<1x16xf32>
    %30 = vector.broadcast %28 : vector<8x1xf32> to vector<8x16xf32>
    %31 = vector.broadcast %29 : vector<1x16xf32> to vector<8x16xf32>
    %32 = arith.mulf %30, %31 : vector<8x16xf32>
    %33 = arith.addf %27, %32 : vector<8x16xf32>
    %34 = vector.extract_strided_slice %8 {offsets = [0, 4], sizes = [8, 1], strides = [1, 1]} : vector<8x8xf32> to vector<8x1xf32>
    %35 = vector.extract_strided_slice %7 {offsets = [2, 0], sizes = [1, 16], strides = [1, 1]} : vector<4x17xf32> to vector<1x16xf32>
    %36 = vector.broadcast %34 : vector<8x1xf32> to vector<8x16xf32>
    %37 = vector.broadcast %35 : vector<1x16xf32> to vector<8x16xf32>
    %38 = arith.mulf %36, %37 : vector<8x16xf32>
    %39 = arith.addf %33, %38 : vector<8x16xf32>
    %40 = vector.extract_strided_slice %8 {offsets = [0, 5], sizes = [8, 1], strides = [1, 1]} : vector<8x8xf32> to vector<8x1xf32>
    %41 = vector.extract_strided_slice %7 {offsets = [2, 1], sizes = [1, 16], strides = [1, 1]} : vector<4x17xf32> to vector<1x16xf32>
    %42 = vector.broadcast %40 : vector<8x1xf32> to vector<8x16xf32>
    %43 = vector.broadcast %41 : vector<1x16xf32> to vector<8x16xf32>
    %44 = arith.mulf %42, %43 : vector<8x16xf32>
    %45 = arith.addf %39, %44 : vector<8x16xf32>
    %46 = vector.extract_strided_slice %8 {offsets = [0, 6], sizes = [8, 1], strides = [1, 1]} : vector<8x8xf32> to vector<8x1xf32>
    %47 = vector.extract_strided_slice %7 {offsets = [3, 0], sizes = [1, 16], strides = [1, 1]} : vector<4x17xf32> to vector<1x16xf32>
    %48 = vector.broadcast %46 : vector<8x1xf32> to vector<8x16xf32>
    %49 = vector.broadcast %47 : vector<1x16xf32> to vector<8x16xf32>
    %50 = arith.mulf %48, %49 : vector<8x16xf32>
    %51 = arith.addf %45, %50 : vector<8x16xf32>
    %52 = vector.extract_strided_slice %8 {offsets = [0, 7], sizes = [8, 1], strides = [1, 1]} : vector<8x8xf32> to vector<8x1xf32>
    %53 = vector.extract_strided_slice %7 {offsets = [3, 1], sizes = [1, 16], strides = [1, 1]} : vector<4x17xf32> to vector<1x16xf32>
    %54 = vector.broadcast %52 : vector<8x1xf32> to vector<8x16xf32>
    %55 = vector.broadcast %53 : vector<1x16xf32> to vector<8x16xf32>
    %56 = arith.mulf %54, %55 : vector<8x16xf32>
    %57 = arith.addf %51, %56 : vector<8x16xf32>
    %c0_7 = arith.constant 0 : index
    %c0_8 = arith.constant 0 : index
    %c0_9 = arith.constant 0 : index
    %58 = vector.load %arg5[%c0_7, %c0_8, %c0_9] : memref<1x8x16xf32, #tpu.memory_space<vmem>>, vector<1x8x16xf32>
    %59 = vector.shape_cast %58 : vector<1x8x16xf32> to vector<8x16xf32>
    %60 = vector.shape_cast %57 : vector<8x16xf32> to vector<1x8x16xf32>
    tpu.vector_store %arg5[%c0_7, %c0_8, %c0_9], %60 {strides = array<i32>} : memref<1x8x16xf32, #tpu.memory_space<vmem>>, vector<1x8x16xf32>,
    return
  }
  func.func @transform_0(%arg0: i32, %arg1: i32) -> (i32, i32, i32) {
    %c1_i32 = arith.constant 1 : i32
    %0 = arith.subi %arg1, %c1_i32 : i32
    %c0_i32 = arith.constant 0 : i32
    %1 = arith.maxsi %0, %c0_i32 : i32
    %c0_i32_0 = arith.constant 0 : i32
    %c0_i32_1 = arith.constant 0 : i32
    return %arg0, %c0_i32_0, %1 : i32, i32, i32
  }
  func.func @transform_1(%arg0: i32, %arg1: i32) -> (i32, i32, i32) {
    %c0_i32 = arith.constant 0 : i32
    %c0_i32_0 = arith.constant 0 : i32
    return %arg0, %c0_i32, %arg1 : i32, i32, i32
  }
  func.func @transform_2(%arg0: i32, %arg1: i32) -> (i32, i32) {
    %c0_i32 = arith.constant 0 : i32
    %c0_i32_0 = arith.constant 0 : i32
    %c0_i32_1 = arith.constant 0 : i32
    return %c0_i32, %c0_i32_0 : i32, i32
  }
  func.func @transform_3(%arg0: i32, %arg1: i32) -> (i32, i32, i32) {
    %c0_i32 = arith.constant 0 : i32
    %c0_i32_0 = arith.constant 0 : i32
    return %arg0, %c0_i32, %arg1 : i32, i32, i32
  }
}

</mosaic_0001>

<bundles_post_ra>
// kernel: tpu_custom_call.1
= control target key start
LH: loop header
LB: loop body
LE: loop exit
PB: predicated region body
PF: predicated region fallthrough
CT: control target
= control target key end

     0   :  { %s979_s0 = inlined_call_operand.hbm [shape: f32[2,4,16], index: 0, kind: input, shape index: {}]   ;;  %s980_s1 = inlined_call_operand.hbm [shape: f32[2,4,16], index: 1, kind: input, shape index: {}]   ;;  %s981_s2 = inlined_call_operand.hbm [shape: f32[8,8], index: 2, kind: input, shape index: {}]   ;;  %s982_s3 = inlined_call_operand.hbm [shape: f32[2,8,16], index: 3, kind: output, shape index: {}]  }
   0x1   :  { %985 = sst [smem:[#allocation16_spill]] %s981_s2 }
   0x2   :  { %8 = vsyncpa [#allocation3], 0 }
   0x3   :  { %10 = vsyncpa [#allocation3 + $0x1], 0 }
   0x4   :  { %11 = vsyncpa [#allocation6], 0 }
   0x5   :  { %13 = vsyncpa [#allocation6 + $0x1], 0 }
   0x6   :  { %14 = vsyncpa [#allocation4], 0 }
   0x7   :  { %16 = vsyncpa [#allocation4 + $0x1], 0  ;;  %s824_s12 = smov 0   ;;  %s826_s13 = smov 0  }
   0x8   :  { %s828_s14 = smov 0   ;;  %s830_s15 = smov 0  }
   0x9   :  { %s832_s16 = smov 0   ;;  %s834_s17 = smov 0  }
   0xa LB: > { %986 = sst [smem:[#allocation13_spill]] %s785_s16  ;;  %s855_s18 = sadd.s32 4294967295, %s789_s17   ;;  %s789_s17 = sphi %s834_s17, %s22_s17   ;;  %s785_s16 = sphi %s832_s16, %s997_s16   ;;  %s781_s15 = sphi %s830_s15, %s996_s15   ;;  %s777_s14 = sphi %s828_s14, %s1000_s14   ;;  %s773_s13 = sphi %s826_s13, %s999_s13   ;;  %s769_s12 = sphi %s824_s12, %s998_s12  }
   0xb   : > { %s493_s19 = sadd.s32 4294967294, %s789_s17   ;;  %p62_p0 = scmp.ne.s32.totalorder %s773_s13, %s769_s12 }
   0xc   : > { %p63_p1 = scmp.eq.s32.totalorder %s855_s18, 0  ;;  %p137_p2 = scmp.eq.s32.totalorder %s855_s18, 1 }
   0xd   : > { %p143_p3 = scmp.eq.s32.totalorder %s493_s19, 1  ;;  %p494_p5 = scmp.ge.s32.totalorder %s789_s17, 1 }
   0xe   : > { %p864_p4 = por %p63_p1, %p62_p0  ;;  %p150_p7 = scmp.lt.s32.totalorder %s789_s17, 3 }
   0xf   : > { %p869_p6 = por %p143_p3, %p62_p0  ;;  %s989_s2 = sld [smem:[#allocation16_spill]] }
  0x10   : > { %p877_p8 = pnand %p494_p5, %p150_p7  ;;  %p496_p9 = scmp.ge.s32.totalorder %s789_s17, 2 }
  0x11   : > { %s791_s26 = smov [#allocation7]   ;;  %s34_s28 = sadd.s32 1, %s785_s16 }
  0x12   : > { %p520_p10 = pneg %p877_p8  ;;  %s164_s27 = sshll.u32 %s791_s26, 4  ;;  %s165_s27 = int_to_ptr.vmem [resolvable:$true] %s164_s27 }
  0x13   : > { %p36_p12 = scmp.ge.s32.totalorder %s34_s28, 2  ;;  %s49_s29 = sadd.s32 1, %s777_s14 }
  0x14   : > { %p521_p11 = pnand %p520_p10, %p63_p1  ;;  %p56_p13 = scmp.ne.s32.totalorder %s777_s14, %s773_s13 }
  0x15   : > { %s162_s24 = sshll.u32 %s989_s2, 4  ;;  %p57_p0 = scmp.eq.s32.totalorder %s789_s17, 0  ;;  %s163_s24 = int_to_ptr.hbm [resolvable:$true] %s162_s24 }
  0x16   : > { %523 = dma.hbm_to_vmem [thread:$0]  (!%p521_p11), %s163_s24, 128, %s165_s27, [#allocation6]  }
  0x17   : > { %s1002_s28 = smov (%p36_p12, %s34_s28), 0  ;;  %p893_p3 = por %p57_p0, %p56_p13 }
  0x18   : > { %991 = sst [smem:[#allocation14_spill]] %s1002_s28  ;;  %p899_p5 = por %p137_p2, %p56_p13 }
  0x19   : > { %s44_s5 = ssub.s32 %s785_s16, %s1002_s28  ;;  %p536_p7 = scmp.lt.s32.totalorder %s789_s17, 2 }
  0x1a   : > { %p47_p10 = scmp.eq.s32.totalorder %s44_s5, 0  ;;  %s175_s6 = sand.u32 1, %s777_s14  }
  0x1b   : > { %s497_s7 = sshll.u32 %s175_s6, 2  ;;  %s498_s9 = sshll.u32 %s785_s16, 2 }
  0x1c   : > { %s908_s8 = scalar_select %p47_p10, %s777_s14, %s49_s29  }
  0x1d   : > { %s187_s19 = scalar_lea.hbm %s979_s0, %s498_s9  ;;  %s179_s22 = scalar_lea.vmem [#allocation2], %s497_s7 }
  0x1e   : > { %994 = sst [smem:[#allocation15_spill]] %s908_s8  ;;  %s191_s23 = sshll.u32 %s179_s22, 4  ;;  %s192_s23 = int_to_ptr.vmem [resolvable:$true] %s191_s23 }
  0x1f   : > { %s189_s24 = sshll.u32 %s187_s19, 4  ;;  %p525_p2 = pnand %p536_p7, %p893_p3  ;;  %s190_s24 = int_to_ptr.hbm [resolvable:$true] %s189_s24 }
  0x20   : > { %s207_s5 = scalar_lea.hbm %s980_s1, %s498_s9  ;;  %s198_s2 = sand.u32 1, %s789_s17  }
  0x21   : > { %s176_s28 = scalar_lea.sflag [#allocation3], %s175_s6  ;;  %s209_s29 = sshll.u32 %s207_s5, 4  ;;  %s210_s29 = int_to_ptr.hbm [resolvable:$true] %s209_s29 }
  0x22   : > { %527 = dma.hbm_to_vmem [thread:$0]  (!%p525_p2), %s190_s24, 64, %s192_s23, %s176_s28  }
  0x23   : > { %s202_s16 = scalar_lea.vmem [#allocation5], %s497_s7  ;;  %s199_s10 = scalar_lea.sflag [#allocation6], %s198_s2 }
  0x24   : > { %s211_s8 = sshll.u32 %s202_s16, 4  ;;  %220 = sbr.rel (%p877_p8) target bundleno = 317 (0x13d), region = 32  ;;  %s212_s8 = int_to_ptr.vmem [resolvable:$true] %s211_s8 }
  0x25   : > { %530 = dma.hbm_to_vmem [thread:$0]  (!%p525_p2), %s210_s29, 64, %s212_s8, %s199_s10  }
  0x26   : > { %s923_s30 = sand.u32 (!%p877_p8), 1, %s773_s13  }
  0x27   : > { %s223_s11 = scalar_lea.sflag (!%p877_p8), [#allocation3], %s923_s30 }
  0x29   : > { %752 = dma.done.wait (%p864_p4), %s223_s11, 64  }
  0x2a   : > { %754 = vsyncadd (%p864_p4), %s223_s11, 4294967232  ;;  %s232_s16 = sand.u32 1, %s855_s18   ;;  %s503_s2 = sshll.u32 %s923_s30, 2 }
  0x2b   : > { %s233_s28 = scalar_lea.sflag [#allocation6], %s232_s16  ;;  %s236_s6 = scalar_lea.vmem [#allocation5], %s503_s2 }
  0x2c   : > { %756 = dma.done.wait (%p864_p4), %s233_s28, 64  }
  0x2d   : > { %758 = vsyncadd (%p864_p4), %s233_s28, 4294967232 }
  0x2e   : > { %760 = dma.done.wait (%p63_p1), [#allocation6], 128  }
  0x2f   : > { %762 = vsyncadd (%p63_p1), [#allocation6], 4294967168  ;;  %v792_v0 = vmov 0.0   ;;  %s793_s25 = smov 113   ;;  %v794_v1 = vmov 1   ;;  %v795_v2 = vmov 5  }
  0x30   : > { %281 = vrot.lane.b32.xlu0 %v792_v0, %s793_s25  ;;  %600 = vset.pattern.permute.xlu1 %v794_v1  ;;  %v796_v3 = vmov 0   ;;  %v290_v4 = vld [vmem:[#allocation7] sm:$0xff]  ;;  %v273_v5 = vld [vmem:[%s236_s6] sm:$0xf]  ;;  %s797_s20 = smov 1   ;;  %v798_v6 = vmov 3  }
  0x31   : > { %602 = vset.pattern.permute.xlu2 %v795_v2  ;;  %604 = vset.pattern.permute.xlu0 %v796_v3  ;;  %v799_v7 = vmov 7   ;;  %v800_v8 = vmov 2   ;;  %v801_v9 = vmov 4   ;;  %v802_v10 = vmov 6   ;;  %s803_s18 = smov 127   ;;  %s505_s7 = sshll.u32 %s923_s30, 3 }
  0x32   : > { %300 = vperm.xlu1 %600, %v290_v4   ;;  %334 = vperm.xlu2 %602, %v290_v4   ;;  %vm288_vm0 = vcmask 7168   ;;  %s507_s8 = sshll.u32 %s781_s15, 3  ;;  %s269_s23 = scalar_lea.vmem [#allocation8], %s505_s7  ;;  %vm360_vm1 = vcmask 130048  }
  0x33   : > { %s374_s22 = scalar_lea.hbm %s982_s3, %s507_s8  ;;  %s376_s24 = sshll.u32 %s269_s23, 4  ;;  %s377_s24 = int_to_ptr.vmem [resolvable:$true] %s376_s24 }
  0x34   : > { %s378_s26 = sshll.u32 %s374_s22, 4  ;;  %s363_s15 = scalar_lea.sflag [#allocation4], %s923_s30  ;;  %s379_s26 = int_to_ptr.hbm [resolvable:$true] %s378_s26 }
  0x35   : > { %s713_s27 = sshra.s32 %s379_s26, 4  ;;  %s719_s11 = scalar_lea.hbm %s982_s3, 16  ;;  %s714_s27 = int_to_ptr.hbm [resolvable:$true] %s713_s27 }
  0x36   : > { %s715_s5 = scalar_lea.hbm %s714_s27, 8  ;;  %p720_p11 = scmp.lt.s32.totalorder %s714_s27, %s982_s3 }
  0x37   : > { %p716_p1 = scmp.ne.s32.totalorder %s714_s27, %s715_s5  ;;  %p721_p12 = scmp.lt.s32.totalorder %s719_s11, %s715_s5 }
  0x38   : > { %285 = vrot.lane.b32.xlu0 %v273_v5, %s797_s20 }
  0x39   : > { %p717_p4 = pnand %p716_p1, %p899_p5  ;;  %p722_p13 = por %p721_p12, %p720_p11 }
  0x3a   : > { %601 = vset.pattern.permute.xlu1 %v798_v6  ;;  %603 = vset.pattern.permute.xlu2 %v799_v7 }
  0x3b   : > { %317 = vperm.xlu1 %601, %v290_v4   ;;  %351 = vperm.xlu2 %603, %v290_v4   ;;  %p718_p8 = pneg %p717_p4 }
  0x3d   : > { %p723_p0 = pnand %p722_p13, %p718_p8 }
  0x40   : > { %293 = vperm.xlu0 %604, %v290_v4  }
  0x43   : > { %605 = vset.pattern.permute.xlu2 %v800_v8  ;;  %607 = vset.pattern.permute.xlu1 %v802_v10 }
  0x44   : > { %310 = vperm.xlu2 %605, %v290_v4  }
  0x48   : > { %608 = vset.pattern.permute.xlu0 %v799_v7 }
  0x4c   : > { %606 = vset.pattern.permute.xlu2 %v801_v9 }
  0x4d   : > { %327 = vperm.xlu2 %606, %v290_v4  }
  0x8c   : > { %v335_v12 = vpop.permute.xlu2 %334 }
  0x95   : > { %v352_v19 = vpop.permute.xlu2 %351 }
  0x9e   : > { %v311_v26 = vpop.permute.xlu2 %310 }
  0xa2   : > { %v282_v11 = vpop.permute.xlu0 %281 }
  0xa4   : > { %v301_v13 = vpop.permute.xlu1 %300 }
  0xa7   : > { %v328_v33 = vpop.permute.xlu2 %327 }
  0xaa   : > { %v286_v14 = vpop.permute.xlu0 %285 }
  0xab   : > { %v289_v15 = vsel %vm288_vm0, %v282_v11, %v286_v14 }
  0xac   : > { %v296_v16 = vperm.slane %v289_v15, 0  ;;  %v347_v17 = vperm.slane %v289_v15, 3  ;;  %v330_v18 = vperm.slane %v289_v15, 2  ;;  %v313_v24 = vperm.slane %v289_v15, 1 }
  0xad   : > { %v318_v23 = vpop.permute.xlu1 %317 }
  0xae   : > { %v354_v20 = vmul.f32 %v352_v19, %v347_v17  ;;  %v337_v21 = vmul.f32 %v335_v12, %v330_v18  ;;  %v303_v22 = vmul.f32 %v301_v13, %v296_v16  ;;  %v320_v25 = vmul.f32 %v318_v23, %v313_v24 }
  0xaf   : > { %v314_v31 = vmul.f32 %v313_v24, %v311_v26  ;;  %v331_v35 = vmul.f32 %v330_v18, %v328_v33 }
  0xb0   : > { %356 = vrot.lane.b32.xlu2 %v354_v20, %s803_s18  ;;  %339 = vrot.lane.b32.xlu0 %v337_v21, %s803_s18 }
  0xb1   : > { %305 = vrot.lane.b32.xlu1 %v303_v22, %s803_s18 }
  0xb2   : > { %v294_v27 = vpop.permute.xlu0 %293 }
  0xb3   : > { %v297_v28 = vmul.f32 %v296_v16, %v294_v27 }
  0xb9   : > { %322 = vrot.lane.b32.xlu1 %v320_v25, %s803_s18 }
  0xc1   : > { %344 = vperm.xlu1 %607, %v290_v4  }
 0x10a   : > { %v357_v43 = vpop.permute.xlu2 %356 }
 0x122   : > { %v340_v38 = vpop.permute.xlu0 %339 }
 0x123   : > { %v306_v29 = vpop.permute.xlu1 %305 }
 0x124   : > { %v308_v30 = vadd.f32 %v306_v29, %v297_v28 }
 0x126   : > { %v315_v32 = vadd.f32 %v314_v31, %v308_v30 }
 0x12b   : > { %v323_v34 = vpop.permute.xlu1 %322 }
 0x12c   : > { %v325_v36 = vadd.f32 %v323_v34, %v315_v32 }
 0x12e   : > { %v332_v37 = vadd.f32 %v331_v35, %v325_v36 }
 0x130   : > { %v342_v40 = vadd.f32 %v340_v38, %v332_v37 }
 0x133   : > { %v345_v39 = vpop.permute.xlu1 %344 }
 0x134   : > { %v348_v41 = vmul.f32 %v347_v17, %v345_v39 }
 0x136   : > { %v349_v42 = vadd.f32 %v348_v41, %v342_v40 }
 0x138   : > { %v359_v44 = vadd.f32 %v357_v43, %v349_v42 }
 0x13a   : > { %361 = vst.msk [vmem:[%s269_s23] sm:$0xff] %vm360_vm1, %v359_v44 }
 0x13b   : > { %726 = shalt.err (!%p723_p0)
}
 0x13c   : > { %518 = dma.vmem_to_hbm [thread:$0]  (%p899_p5), %s377_s24, 128, %s379_s26, %s363_s15  }
 0x13d PF: > { %s390_s30 = sand.u32 1, %s769_s12   ;;  %p532_p3 = pnand %p496_p9, %p869_p6 }
 0x13e   : > { %s391_s28 = scalar_lea.sflag [#allocation4], %s390_s30 }
 0x13f   : > { %p533_p7 = pneg %p532_p3 }
 0x141   : > { %764 = dma.done.wait (%p533_p7), %s391_s28, 128  }
 0x142   : > { %766 = vsyncadd (%p533_p7), %s391_s28, 4294967168  ;;  %s22_s17 = sadd.s32 1, %s789_s17   ;;  %s995_s6 = sld [smem:[#allocation15_spill]] }
 0x143   : > { %p19_p10 = scmp.ge.s32.totalorder %s22_s17, 4   ;;  %s996_s15 = sld [smem:[#allocation13_spill]] }
 0x144   : > { %s997_s16 = sld [smem:[#allocation14_spill]]  ;;  %s998_s12 = smov %s773_s13 }
 0x145   : > { %s999_s13 = smov %s777_s14  ;;  %21 = sbr.rel (!%p19_p10) target bundleno = 10 (0xa), region = 94 }
 0x148   : > { %s1000_s14 = smov %s995_s6 }
 0x14a   :  { %397 = vsyncpa [#allocation3], 1 }
 0x14b   :  { %399 = vsyncpa [#allocation3 + $0x1], 1 }
 0x14c   :  { %400 = vsyncpa [#allocation6], 1 }
 0x14d   :  { %402 = vsyncpa [#allocation6 + $0x1], 1 }
 0x14e   :  { %403 = vsyncpa [#allocation4], 1 }
 0x14f   :  { %405 = vsyncpa [#allocation4 + $0x1], 1 }

</bundles_post_ra>
